<compile_context>
chip_gen: v7x
topology: tpu7x:2x2x1
jax: 0.10.0
libtpu: 0.0.40
codegen_flags: <defaults>
</compile_context>

<pallas_src>
import jax
import jax.numpy as jnp
from jax import lax
from jax.experimental import pallas as pl
from jax.experimental.pallas import tpu as pltpu


def _round_up(x, m):
    return (x + m - 1) // m * m


def _pick_tile(h, target=8):
    t = max(1, min(h, target))
    while h % t:
        t -= 1
    return t


def _conv_bn_relu_kernel(x_ref, w_ref, shift_ref, o_ref):
    # x_ref:     (1, H+2, W, 3*CinP)  kx-folded, zero-padded input (VMEM-resident per image)
    # w_ref:     (3, 3*CinP, CoutP)   per-ky weight matrices (BN scale already folded in)
    # shift_ref: (1, CoutP)           folded BN shift (f32)
    # o_ref:     (1, TH, W, CoutP)    output tile, lane-dense CoutP (multiple of 128)
    TH = o_ref.shape[1]
    W = o_ref.shape[2]
    CoutP = o_ref.shape[3]
    K3 = w_ref.shape[1]

    h0 = pl.multiple_of(pl.program_id(1) * TH, TH)

    # For TH*W = 128 the accumulator is 16 vregs; for much larger tiles move it to a
    # pltpu.VMEM scratch instead of a live value.
    acc = jnp.zeros((TH * W, CoutP), jnp.float32)
    for ky in range(3):  # static unroll: only H (a non-tiled major dim) is sliced
        slab = x_ref[0, pl.ds(h0 + ky, TH), :, :]            # (TH, W, 3*CinP)
        slab = slab.reshape(TH * W, K3)                      # W folded into M, channels on lanes
        acc = acc + jnp.dot(slab, w_ref[ky],
                            preferred_element_type=jnp.float32)

    y = jnp.maximum(acc + shift_ref[0, :], 0.0)              # fused BN shift + ReLU
    o_ref[0, :, :, :] = y.reshape(TH, W, CoutP).astype(o_ref.dtype)


def conv_bn_relu_nhwc(x_nhwc, w_oihw, gamma, beta, running_mean, running_var,
                      eps=1e-5, compute_dtype=jnp.bfloat16, block_h=8):
    """Conv2d(3x3,s1,p1,g1,bias=False) + BatchNorm2d(eval) + ReLU. NHWC in / NHWC out."""
    N, H, W, Cin = x_nhwc.shape
    Cout = w_oihw.shape[0]
    assert w_oihw.shape == (Cout, Cin, 3, 3)
    # TODO(synk): non-default module configs (kernel_size=1, stride>1, groups>1, dilation>1)
    # are not implemented; only the default 3x3/s1/g1/d1 forward path is covered.

    CinP = _round_up(Cin, 8)        # sublane-friendly contraction lanes
    CoutP = _round_up(Cout, 128)    # lane-dense output, full MXU width along N
    K3 = 3 * CinP
    TH = _pick_tile(H, block_h)
    Hp = H + 2

    # --- input prep: pad Cin -> CinP, zero-pad spatially, fold the 3 kx taps onto channels.
    x_f = x_nhwc.astype(jnp.float32)
    if CinP > Cin:
        x_f = jnp.pad(x_f, ((0, 0), (0, 0), (0, 0), (0, CinP - Cin)))
    x_pad = jnp.pad(x_f, ((0, 0), (1, 1), (1, 1), (0, 0)))               # (N, Hp, Wp, CinP)
    x_kx = jnp.concatenate([x_pad[:, :, kx:kx + W, :] for kx in range(3)],
                           axis=-1).astype(compute_dtype)                # (N, Hp, W, 3*CinP)

    # --- weights: fold BN scale, reorder to (ky, kx*CinP + cin, CoutP).
    scale = gamma.astype(jnp.float32) / jnp.sqrt(running_var.astype(jnp.float32) + eps)
    shift = beta.astype(jnp.float32) - running_mean.astype(jnp.float32) * scale
    w_s = w_oihw.astype(jnp.float32) * scale[:, None, None, None]        # (Cout, Cin, 3, 3)
    w_t = jnp.transpose(w_s, (2, 3, 1, 0))                               # (ky, kx, Cin, Cout)
    w_t = jnp.pad(w_t, ((0, 0), (0, 0), (0, CinP - Cin), (0, CoutP - Cout)))
    w_k = w_t.reshape(3, K3, CoutP).astype(compute_dtype)
    shift_p = jnp.pad(shift, (0, CoutP - Cout)).reshape(1, CoutP).astype(jnp.float32)

    out_padded = pl.pallas_call(
        _conv_bn_relu_kernel,
        out_shape=jax.ShapeDtypeStruct((N, H, W, CoutP), x_nhwc.dtype),
        grid_spec=pltpu.PrefetchScalarGridSpec(
            num_scalar_prefetch=0,
            grid=(N, H // TH),
            in_specs=[
                # whole padded image: same block index across its H-tiles -> stays resident
                pl.BlockSpec((1, Hp, W, K3), lambda n, h: (n, 0, 0, 0)),
                pl.BlockSpec((3, K3, CoutP), lambda n, h: (0, 0, 0)),
                pl.BlockSpec((1, CoutP), lambda n, h: (0, 0)),
            ],
            out_specs=pl.BlockSpec((1, TH, W, CoutP), lambda n, h: (n, h, 0, 0)),
        ),
        compiler_params=pltpu.CompilerParams(
            dimension_semantics=("parallel", "parallel"),
            vmem_limit_bytes=32 * 1024 * 1024),
    )(x_kx, w_k, shift_p)

    return out_padded[:, :, :, :Cout]


def conv_bn_relu(x_nchw, w_oihw, gamma, beta, running_mean, running_var,
                 eps=1e-5, compute_dtype=jnp.bfloat16, block_h=8):
    """NCHW wrapper matching the PyTorch Conv.forward exactly."""
    # NOTE: if the surrounding model is NHWC end-to-end, call conv_bn_relu_nhwc directly
    # and skip these two full-tensor layout transposes (extra HBM passes).
    x_nhwc = jnp.transpose(x_nchw, (0, 2, 3, 1))
    out = conv_bn_relu_nhwc(x_nhwc, w_oihw, gamma, beta, running_mean, running_var,
                            eps=eps, compute_dtype=compute_dtype, block_h=block_h)
    return jnp.transpose(out, (0, 3, 1, 2))


def _reference(x_nchw, w_oihw, gamma, beta, running_mean, running_var, eps=1e-5):
    y = lax.conv_general_dilated(
        x_nchw.astype(jnp.float32), w_oihw.astype(jnp.float32),
        window_strides=(1, 1), padding=((1, 1), (1, 1)),
        dimension_numbers=("NCHW", "OIHW", "NCHW"))
    scale = gamma / jnp.sqrt(running_var + eps)
    shift = beta - running_mean * scale
    y = y * scale[None, :, None, None] + shift[None, :, None, None]
    return jnp.maximum(y, 0.0)


if __name__ == "__main__":
    key = jax.random.PRNGKey(0)
    k_x, k_w = jax.random.split(key)

    N, Cin, Cout, H, W = 2, 4, 8, 16, 16

    x = jax.random.normal(k_x, (N, Cin, H, W), dtype=jnp.float32)
    w = jax.random.normal(k_w, (Cout, Cin, 3, 3), dtype=jnp.float32) * 0.1
    # BatchNorm2d default (eval-mode) parameters.
    gamma = jnp.ones((Cout,), jnp.float32)
    beta = jnp.zeros((Cout,), jnp.float32)
    running_mean = jnp.zeros((Cout,), jnp.float32)
    running_var = jnp.ones((Cout,), jnp.float32)

    ref = _reference(x, w, gamma, beta, running_mean, running_var)

    # f32 operand path (recommended on v5e): tight tolerance.
    out_f32 = jax.block_until_ready(
        conv_bn_relu(x, w, gamma, beta, running_mean, running_var,
                     compute_dtype=jnp.float32))
    assert out_f32.shape == (N, Cout, H, W)
    assert jnp.allclose(out_f32, ref, atol=1e-4, rtol=1e-4)

    # bf16 operand path (v6e/v7x MXU fast path, f32 accumulation): bf16-rounding tolerance.
    out_bf16 = jax.block_until_ready(
        conv_bn_relu(x, w, gamma, beta, running_mean, running_var,
                     compute_dtype=jnp.bfloat16))
    assert out_bf16.shape == (N, Cout, H, W)
    assert jnp.allclose(out_bf16, ref, atol=3e-2, rtol=3e-2)

    print("KERNEL_OK")
</pallas_src>

<mosaic_0001>
module attributes {stable_mosaic.version = 11 : i64} {
  func.func @_conv_bn_relu_kernel(%arg0: i32, %arg1: i32, %arg2: memref<1x18x16x24xf32, #tpu.memory_space<vmem>>, %arg3: memref<3x24x128xf32, #tpu.memory_space<vmem>>, %arg4: memref<1x128xf32, #tpu.memory_space<vmem>>, %arg5: memref<1x8x16x128xf32, #tpu.memory_space<vmem>>) attributes {dimension_semantics = [#tpu.dimension_semantics<parallel>, #tpu.dimension_semantics<parallel>], iteration_bounds = array<i64: 2, 2>, scalar_prefetch = 0 : i64, scratch_operands = 0 : i64, tpu.core_type = #tpu.core_type<tc>, window_params = [{transform_indices = @transform_0, window_bounds = array<i64: 1, 18, 16, 24>}, {pipeline_mode = #tpu.pipeline_mode<synchronous>, transform_indices = @transform_1, window_bounds = array<i64: 3, 24, 128>}, {pipeline_mode = #tpu.pipeline_mode<synchronous>, transform_indices = @transform_2, window_bounds = array<i64: 1, 128>}, {transform_indices = @transform_3, window_bounds = array<i64: 1, 8, 16, 128>}]} {
    %c8_i32 = arith.constant 8 : i32
    %0 = arith.muli %arg1, %c8_i32 : i32
    %1 = tpu.assume_multiple %0, 8 : i32
    %cst = arith.constant 0.000000e+00 : f32
    %2 = vector.broadcast %cst : f32 to vector<128x128xf32>
    %c0_i32 = arith.constant 0 : i32
    %3 = arith.addi %1, %c0_i32 : i32
    %c0 = arith.constant 0 : index
    %4 = arith.index_cast %3 : i32 to index
    %c0_0 = arith.constant 0 : index
    %c0_1 = arith.constant 0 : index
    %5 = vector.load %arg2[%c0, %4, %c0_0, %c0_1] : memref<1x18x16x24xf32, #tpu.memory_space<vmem>>, vector<1x8x16x24xf32>
    %6 = vector.shape_cast %5 : vector<1x8x16x24xf32> to vector<8x16x24xf32>
    %7 = vector.shape_cast %6 : vector<8x16x24xf32> to vector<128x24xf32>
    %c0_2 = arith.constant 0 : index
    %c0_3 = arith.constant 0 : index
    %c0_4 = arith.constant 0 : index
    %8 = vector.load %arg3[%c0_2, %c0_3, %c0_4] : memref<3x24x128xf32, #tpu.memory_space<vmem>>, vector<1x24x128xf32>
    %9 = vector.shape_cast %8 : vector<1x24x128xf32> to vector<24x128xf32>
    %cst_5 = arith.constant dense<0.000000e+00> : vector<128x128xf32>
    %10 = tpu.matmul %7, %9, %cst_5 {dimension_numbers = #tpu.dot_dimension_numbers<[1], [0], [0], [1], [0, 0, 1, 1], [], []>} : vector<128x24xf32>, vector<24x128xf32>, vector<128x128xf32> -> vector<128x128xf32>
    %11 = arith.addf %2, %10 : vector<128x128xf32>
    %c1_i32 = arith.constant 1 : i32
    %12 = arith.addi %1, %c1_i32 : i32
    %c0_6 = arith.constant 0 : index
    %13 = arith.index_cast %12 : i32 to index
    %c0_7 = arith.constant 0 : index
    %c0_8 = arith.constant 0 : index
    %14 = vector.load %arg2[%c0_6, %13, %c0_7, %c0_8] : memref<1x18x16x24xf32, #tpu.memory_space<vmem>>, vector<1x8x16x24xf32>
    %15 = vector.shape_cast %14 : vector<1x8x16x24xf32> to vector<8x16x24xf32>
    %16 = vector.shape_cast %15 : vector<8x16x24xf32> to vector<128x24xf32>
    %c1 = arith.constant 1 : index
    %c0_9 = arith.constant 0 : index
    %c0_10 = arith.constant 0 : index
    %17 = vector.load %arg3[%c1, %c0_9, %c0_10] : memref<3x24x128xf32, #tpu.memory_space<vmem>>, vector<1x24x128xf32>
    %18 = vector.shape_cast %17 : vector<1x24x128xf32> to vector<24x128xf32>
    %cst_11 = arith.constant dense<0.000000e+00> : vector<128x128xf32>
    %19 = tpu.matmul %16, %18, %cst_11 {dimension_numbers = #tpu.dot_dimension_numbers<[1], [0], [0], [1], [0, 0, 1, 1], [], []>} : vector<128x24xf32>, vector<24x128xf32>, vector<128x128xf32> -> vector<128x128xf32>
    %20 = arith.addf %11, %19 : vector<128x128xf32>
    %c2_i32 = arith.constant 2 : i32
    %21 = arith.addi %1, %c2_i32 : i32
    %c0_12 = arith.constant 0 : index
    %22 = arith.index_cast %21 : i32 to index
    %c0_13 = arith.constant 0 : index
    %c0_14 = arith.constant 0 : index
    %23 = vector.load %arg2[%c0_12, %22, %c0_13, %c0_14] : memref<1x18x16x24xf32, #tpu.memory_space<vmem>>, vector<1x8x16x24xf32>
    %24 = vector.shape_cast %23 : vector<1x8x16x24xf32> to vector<8x16x24xf32>
    %25 = vector.shape_cast %24 : vector<8x16x24xf32> to vector<128x24xf32>
    %c2 = arith.constant 2 : index
    %c0_15 = arith.constant 0 : index
    %c0_16 = arith.constant 0 : index
    %26 = vector.load %arg3[%c2, %c0_15, %c0_16] : memref<3x24x128xf32, #tpu.memory_space<vmem>>, vector<1x24x128xf32>
    %27 = vector.shape_cast %26 : vector<1x24x128xf32> to vector<24x128xf32>
    %cst_17 = arith.constant dense<0.000000e+00> : vector<128x128xf32>
    %28 = tpu.matmul %25, %27, %cst_17 {dimension_numbers = #tpu.dot_dimension_numbers<[1], [0], [0], [1], [0, 0, 1, 1], [], []>} : vector<128x24xf32>, vector<24x128xf32>, vector<128x128xf32> -> vector<128x128xf32>
    %29 = arith.addf %20, %28 : vector<128x128xf32>
    %c0_18 = arith.constant 0 : index
    %c0_19 = arith.constant 0 : index
    %30 = vector.load %arg4[%c0_18, %c0_19] : memref<1x128xf32, #tpu.memory_space<vmem>>, vector<1x128xf32>
    %31 = vector.shape_cast %30 : vector<1x128xf32> to vector<128xf32>
    %32 = vector.shape_cast %31 : vector<128xf32> to vector<1x128xf32>
    %33 = vector.broadcast %32 : vector<1x128xf32> to vector<128x128xf32>
    %34 = arith.addf %29, %33 : vector<128x128xf32>
    %cst_20 = arith.constant 0.000000e+00 : f32
    %35 = vector.broadcast %cst_20 : f32 to vector<128x128xf32>
    %36 = arith.maximumf %34, %35 : vector<128x128xf32>
    %37 = vector.shape_cast %36 : vector<128x128xf32> to vector<8x16x128xf32>
    %c0_21 = arith.constant 0 : index
    %c0_22 = arith.constant 0 : index
    %c0_23 = arith.constant 0 : index
    %c0_24 = arith.constant 0 : index
    %38 = vector.load %arg5[%c0_21, %c0_22, %c0_23, %c0_24] : memref<1x8x16x128xf32, #tpu.memory_space<vmem>>, vector<1x8x16x128xf32>
    %39 = vector.shape_cast %38 : vector<1x8x16x128xf32> to vector<8x16x128xf32>
    %40 = vector.shape_cast %37 : vector<8x16x128xf32> to vector<1x8x16x128xf32>
    tpu.vector_store %arg5[%c0_21, %c0_22, %c0_23, %c0_24], %40 {strides = array<i32>} : memref<1x8x16x128xf32, #tpu.memory_space<vmem>>, vector<1x8x16x128xf32>,
    return
  }
  func.func @transform_0(%arg0: i32, %arg1: i32) -> (i32, i32, i32, i32) {
    %c0_i32 = arith.constant 0 : i32
    %c0_i32_0 = arith.constant 0 : i32
    %c0_i32_1 = arith.constant 0 : i32
    %c0_i32_2 = arith.constant 0 : i32
    return %arg0, %c0_i32, %c0_i32_0, %c0_i32_1 : i32, i32, i32, i32
  }
  func.func @transform_1(%arg0: i32, %arg1: i32) -> (i32, i32, i32) {
    %c0_i32 = arith.constant 0 : i32
    %c0_i32_0 = arith.constant 0 : i32
    %c0_i32_1 = arith.constant 0 : i32
    %c0_i32_2 = arith.constant 0 : i32
    return %c0_i32, %c0_i32_0, %c0_i32_1 : i32, i32, i32
  }
  func.func @transform_2(%arg0: i32, %arg1: i32) -> (i32, i32) {
    %c0_i32 = arith.constant 0 : i32
    %c0_i32_0 = arith.constant 0 : i32
    %c0_i32_1 = arith.constant 0 : i32
    return %c0_i32, %c0_i32_0 : i32, i32
  }
  func.func @transform_3(%arg0: i32, %arg1: i32) -> (i32, i32, i32, i32) {
    %c0_i32 = arith.constant 0 : i32
    %c0_i32_0 = arith.constant 0 : i32
    %c0_i32_1 = arith.constant 0 : i32
    return %arg0, %arg1, %c0_i32, %c0_i32_0 : i32, i32, i32, i32
  }
}

</mosaic_0001>

<bundles_post_ra>
// kernel: tpu_custom_call.1
= control target key start
LH: loop header
LB: loop body
LE: loop exit
PB: predicated region body
PF: predicated region fallthrough
CT: control target
= control target key end

     0   :  { %s2082_s0 = inlined_call_operand.hbm [shape: f32[2,18,16,24], index: 0, kind: input, shape index: {}]   ;;  %s2083_s1 = inlined_call_operand.hbm [shape: f32[3,24,128], index: 1, kind: input, shape index: {}]   ;;  %s2084_s2 = inlined_call_operand.vmem [shape: f32[1,128], index: 2, kind: input, shape index: {}]   ;;  %s2085_s3 = inlined_call_operand.hbm [shape: f32[2,16,16,128], index: 3, kind: output, shape index: {}]  }
   0x1   :  { %2098 = sst [smem:[#allocation16_spill]] %s2083_s1 }
   0x2   :  { %8 = vsyncpa [#allocation3], 0 }
   0x3   :  { %10 = vsyncpa [#allocation3 + $0x1], 0 }
   0x4   :  { %11 = vsyncpa [#allocation6], 0 }
   0x5   :  { %12 = vsyncpa [#allocation4], 0 }
   0x6   :  { %14 = vsyncpa [#allocation4 + $0x1], 0  ;;  %s1697_s12 = smov 0   ;;  %s1699_s13 = smov 0  }
   0x7   :  { %s1701_s14 = smov 0   ;;  %s1703_s15 = smov 0  }
   0x8   :  { %s1705_s16 = smov 0   ;;  %s1707_s17 = smov 0  }
   0x9   :  { %s1709_s18 = smov 0   ;;  %s1711_s19 = smov 0  }
   0xa   :  { %s1713_s20 = smov 0   ;;  %s1715_s21 = smov 0  }
   0xb   :  { %s1717_s22 = smov 0  }
   0xc LB: > { %2099 = sst [smem:[#allocation11_spill]] %s1628_s12  ;;  %s1062_s23 = sadd.s32 4294967295, %s1668_s22   ;;  %s1668_s22 = sphi %s1717_s22, %s20_s22   ;;  %s1664_s21 = sphi %s1715_s21, %s2132_s21   ;;  %s1660_s20 = sphi %s1713_s20, %s2123_s20   ;;  %s1656_s19 = sphi %s1711_s19, %s2131_s19   ;;  %s1652_s18 = sphi %s1709_s18, %s2122_s18   ;;  %s1648_s17 = sphi %s1707_s17, %s2130_s17   ;;  %s1644_s16 = sphi %s1705_s16, %s2129_s16   ;;  %s1640_s15 = sphi %s1703_s15, %s2128_s15   ;;  %s1636_s14 = sphi %s1701_s14, %s2127_s14   ;;  %s1632_s13 = sphi %s1699_s13, %s2126_s13   ;;  %s1628_s12 = sphi %s1697_s12, %s2125_s12  }
   0xd   : > { %2100 = sst [smem:[#allocation12_spill]] %s1660_s20  ;;  %s1063_s24 = sadd.s32 4294967294, %s1668_s22  }
   0xe   : > { %p52_p0 = scmp.ne.s32.totalorder %s1644_s16, %s1640_s15  ;;  %p1753_p1 = scmp.eq.s32.totalorder %s1062_s23, 0 }
   0xf   : > { %s109_s26 = sadd.s32 1, %s1636_s14  ;;  %p119_p2 = scmp.ne.s32.totalorder %s1636_s14, %s1632_s13 }
  0x10   : > { %s2101_s25 = scalar_select %p1753_p1, 1, 0 }
  0x11   : > { %p1762_p3 = por %p1753_p1, %p52_p0  ;;  %p120_p4 = scmp.eq.s32.totalorder %s1062_s23, 3 }
  0x12   : > { %p125_p5 = scmp.ne.s32.totalorder %s1632_s13, %s1628_s12  ;;  %p126_p6 = scmp.eq.s32.totalorder %s1063_s24, 3 }
  0x13   : > { %s2102_s27 = scalar_select %p1762_p3, 1, 0 }
  0x14   : > { %p1768_p7 = por %p120_p4, %p119_p2  ;;  %p1064_p8 = scmp.ge.s32.totalorder %s1668_s22, 1 }
  0x15   : > { %p1773_p9 = por %p126_p6, %p125_p5  ;;  %p133_p10 = scmp.lt.s32.totalorder %s1668_s22, 5 }
  0x16   : > { %s2103_s28 = scalar_select %p1768_p7, 1, 0 }
  0x17   : > { %s2104_s29 = scalar_select %p1773_p9, 1, 0 }
  0x18   : > { %p1778_p11 = pnand %p1064_p8, %p133_p10  ;;  %s1670_s4 = smov [#allocation5]  }
  0x19   : > { %2105 = sst [smem:[#allocation13_spill]] %s2104_s29  ;;  %s145_s5 = sshll.u32 %s1670_s4, 4  ;;  %s146_s5 = int_to_ptr.vmem [resolvable:$true] %s145_s5 }
  0x1a   : > { %s2106_s30 = scalar_select %p1778_p11, 1, 0 }
  0x1b   : > { %p1375_p12 = pneg %p1778_p11  ;;  %s2108_s1 = sld [smem:[#allocation16_spill]] }
  0x1d   : > { %p1786_p13 = pnand %p1375_p12, %p1753_p1 }
  0x1f   : > { %p1486_p2 = pneg %p1786_p13 }
  0x21   : > { %s1484_s9 = scalar_lea.hbm %s2108_s1, 1152 }
  0x22   : > { %p1485_p0 = scmp.ne.s32.totalorder %s2108_s1, %s1484_s9  ;;  %p1491_p6 = scmp.lt.u32.totalorder %s1484_s9, %s2108_s1 }
  0x24   : > { %p1487_p4 = pnand %p1486_p2, %p1485_p0 }
  0x26   : > { %p1488_p5 = pneg %p1487_p4 }
  0x28   : > { %p1493_p8 = pnand %p1491_p6, %p1488_p5 }
  0x2a   : > { %1496 = shalt.err (!%p1493_p8)
}
  0x2b   : > { %s1497_s24 = scalar_lea.vmem %s146_s5, 1152  ;;  %p1505_p7 = scmp.lt.s32.totalorder %s146_s5, %s146_s5 }
  0x2c   : > { %p1498_p10 = scmp.ne.s32.totalorder %s146_s5, %s1497_s24  ;;  %p1506_p1 = scmp.lt.s32.totalorder %s1497_s24, %s1497_s24 }
  0x2e   : > { %p1500_p12 = pnand %p1498_p10, %p1486_p2  ;;  %p1507_p3 = por %p1506_p1, %p1505_p7 }
  0x30   : > { %p1501_p9 = pneg %p1500_p12 }
  0x32   : > { %p1508_p11 = pnand %p1507_p3, %p1501_p9 }
  0x34   : > { %1511 = shalt.err (!%p1508_p11)
}
  0x35   : > { %s2091_s4 = smov 128   ;;  %s2092_s7 = smov 8  }
  0x36   : > { %1378 = dma.hbm_to_vmem [thread:$0]  (!%p1786_p13), %s2108_s1, 1152, %s146_s5, [#allocation6], %s2091_s4, %s2091_s4, %s2092_s7  }
  0x37   : > { %s29_s10 = sadd.s32 1, %s1660_s20  ;;  %s32_s11 = sadd.s32 1, %s1664_s21 }
  0x38   : > { %p30_p1 = scmp.ge.s32.totalorder %s29_s10, 2  ;;  %s39_s15 = sadd.s32 1, %s1648_s17 }
  0x39   : > { %p46_p3 = scmp.ne.s32.totalorder %s1648_s17, %s1644_s16  ;;  %p47_p7 = scmp.eq.s32.totalorder %s1668_s22, 0 }
  0x3a   : > { %s2134_s10 = smov (%p30_p1, %s29_s10), 0  ;;  %s2136_s11 = smov (!%p30_p1, %s32_s11), %s1664_s21 }
  0x3b   : > { %2109 = sst [smem:[#allocation14_spill]] %s2134_s10  ;;  %s105_s6 = ssub.s32 %s1660_s20, %s2134_s10 }
  0x3c   : > { %p34_p9 = scmp.ge.s32.totalorder %s2136_s11, 2  ;;  %p1388_p11 = scmp.lt.s32.totalorder %s1668_s22, 4 }
  0x3d   : > { %p1821_p13 = por %p47_p7, %p46_p3  ;;  %s162_s23 = sand.u32 1, %s1648_s17  }
  0x3e   : > { %s2138_s11 = smov (%p34_p9, %s2136_s11), 0  ;;  %s1364_s24 = smul.u32 288, %s162_s23 }
  0x3f   : > { %2111 = sst [smem:[#allocation15_spill]] %s2138_s11  ;;  %s36_s8 = ssub.s32 %s1664_s21, %s2138_s11 }
  0x40   : > { %s1365_s9 = smul.u32 4608, %s1664_s21  ;;  %p37_p0 = scmp.eq.s32.totalorder %s36_s8, 0 }
  0x41   : > { %s106_s4 = sor.u32 %s105_s6, %s36_s8  ;;  %s166_s12 = scalar_lea.vmem [#allocation2], %s1364_s24 }
  0x42   : > { %p107_p2 = scmp.eq.s32.totalorder %s106_s4, 0  ;;  %s1842_s29 = scalar_lea.hbm %s2082_s0, %s1365_s9 }
  0x43   : > { %s1832_s7 = scalar_select %p37_p0, %s1648_s17, %s39_s15  }
  0x44   : > { %s1837_s1 = scalar_select %p107_p2, %s1636_s14, %s109_s26  }
  0x45   : > { %s173_s11 = sshll.u32 %s166_s12, 4  ;;  %p1850_p4 = pnand %p1388_p11, %p1821_p13  ;;  %s1844_s11 = int_to_ptr.vmem [resolvable:$true] %s173_s11 }
  0x46   : > { %s1854_s26 = scalar_lea.sflag [#allocation3], %s162_s23  ;;  %s1512_s20 = scalar_lea.hbm %s1842_s29, 4608 }
  0x47   : > { %p1513_p5 = scmp.ne.s32.totalorder %s1842_s29, %s1512_s20  ;;  %p1514_p6 = pneg %p1850_p4 }
  0x48   : > { %s1517_s15 = scalar_lea.hbm %s2082_s0, 9216  ;;  %p1518_p12 = scmp.lt.u32.totalorder %s1842_s29, %s2082_s0 }
  0x49   : > { %p1515_p8 = pnand %p1514_p6, %p1513_p5  ;;  %p1519_p1 = scmp.lt.u32.totalorder %s1517_s15, %s1512_s20 }
  0x4a   : > { %p1521_p7 = scmp.lt.u32.totalorder %s1512_s20, %s1842_s29 }
  0x4b   : > { %p1516_p10 = pneg %p1515_p8  ;;  %p1520_p3 = por %p1519_p1, %p1518_p12 }
  0x4d   : > { %p1522_p9 = por %p1521_p7, %p1520_p3 }
  0x4f   : > { %p1523_p11 = pnand %p1522_p9, %p1516_p10 }
  0x51   : > { %1526 = shalt.err (!%p1523_p11)
}
  0x52   : > { %s1527_s23 = scalar_lea.vmem %s1844_s11, 4608  ;;  %s1673_s24 = smov [#allocation2]  }
  0x53   : > { %p1528_p13 = scmp.ne.s32.totalorder %s1844_s11, %s1527_s23  ;;  %s1532_s8 = sshll.u32 %s1673_s24, 4  ;;  %s1533_s8 = int_to_ptr.vmem [resolvable:$false] %s1532_s8 }
  0x54   : > { %s1534_s9 = scalar_lea.vmem %s1533_s8, 9216  ;;  %p1535_p5 = scmp.lt.s32.totalorder %s1844_s11, %s1533_s8 }
  0x55   : > { %p1530_p0 = pnand %p1528_p13, %p1514_p6  ;;  %p1536_p8 = scmp.lt.s32.totalorder %s1534_s9, %s1527_s23 }
  0x57   : > { %p1531_p2 = pneg %p1530_p0  ;;  %p1537_p12 = por %p1536_p8, %p1535_p5 }
  0x59   : > { %p1538_p1 = pnand %p1537_p12, %p1531_p2 }
  0x5b   : > { %1541 = shalt.err (!%p1538_p1)
}
  0x5c   : > { %s2113_s20 = smov 8   ;;  %s2114_s12 = smov 128  }
  0x5d   : > { %1382 = dma.hbm_to_vmem [thread:$0]  (!%p1850_p4), %s1842_s29, 4608, %s1844_s11, %s1854_s26, %s2114_s12, %s2114_s12, %s2113_s20  }
  0x5e   : > { %p2115_p6 = scmp.ne.s32.totalorder %s2106_s30, 0 }
  0x5f   : > { %s187_s10 = sand.u32 (!%p2115_p6), 1, %s1644_s16   ;;  %p2116_p10 = scmp.ne.s32.totalorder (!%p2115_p6), %s2102_s27, 0 }
  0x60   : > { %185 = sbr.rel (%p2115_p6) target bundleno = 395 (0x18b), region = 32  ;;  %s188_s6 = scalar_lea.sflag (!%p2115_p6), [#allocation3], %s187_s10 }
  0x61   : > { %s1366_s15 = smul.u32 (!%p2115_p6), 288, %s187_s10 }
  0x63   : > { %s191_s5 = scalar_lea.vmem (!%p2115_p6), [#allocation2], %s1366_s15 }
  0x67   : > { %1615 = dma.done.wait (%p2116_p10), %s188_s6, 4608  }
  0x68   : > { %1617 = vsyncadd (%p2116_p10), %s188_s6, 4294962688  ;;  %p2117_p3 = scmp.ne.s32.totalorder %s2101_s25, 0 }
  0x6a   : > { %1619 = dma.done.wait (%p2117_p3), [#allocation6], 1152  }
  0x6b   : > { %1621 = vsyncadd (%p2117_p3), [#allocation6], 4294966144  ;;  %s1165_s29 = sshll.u32 %s1652_s18, 7  ;;  %v261_v0 = vld [vmem:[#allocation5 + $0x18] sm:$0xff]  ;;  %v262_v1 = vld [vmem:[#allocation5 + $0x20] sm:$0xff]  ;;  %vm264_vm0 = vcmask 195584  }
  0x6c   : > { %s1897_s30 = scalar_lea.vmem %s191_s5, %s1165_s29 [#allocation2]  ;;  %v238_v2 = vld [vmem:[#allocation5] sm:$0xff]  ;;  %v1316_v3 = vpack.c.bf16 %v262_v1, %v261_v0  ;;  %v239_v4 = vld [vmem:[#allocation5 + $0x8] sm:$0xff]  ;;  %v240_v8 = vld [vmem:[#allocation5 + $0x10] sm:$0xff]  ;;  %s215_s25 = sand.u32 1, %s1632_s13  }
  0x6d   : > { %v1320_v5 = vpack.c.bf16 %v239_v4, %v238_v2  ;;  %v263_v6 = vld [vmem:[#allocation5 + $0x28] sm:$0xff]  ;;  %v1075_v7 = vld [vmem:[%s1897_s30 + $0x10] sm:$0xff]  ;;  %v222_v9 = vld [vmem:[%s1897_s30] sm:$0xff]  ;;  %s1070_s4 = sshll.u32 %s215_s25, 7  ;;  %s1168_s23 = sshll.u32 %s1652_s18, 4 }
  0x6e   : > { %1317 = vmatprep.subr.bf16.mxu1 %v1316_v3  ;;  %1232 = vmatprep.mubr.msk.f32.mxu1 %vm264_vm0, %v1075_v7  ;;  %v671_v10 = vld [vmem:[#allocation5 + $0x30] sm:$0xff]  ;;  %v672_v11 = vld [vmem:[#allocation5 + $0x38] sm:$0xff]  ;;  %v223_v13 = vld [vmem:[%s1897_s30 + $0x8] sm:$0xff]  ;;  %s1977_s26 = scalar_lea.vmem [#allocation7], %s1070_s4  ;;  %s1161_s24 = sshll.u32 %s1656_s19, 5 }
  0x6f   : > { %1321 = vmatprep.subr.bf16.mxu0 %v1320_v5  ;;  %1319 = vmatpush3.bf16.msra.mxu1 %v1316_v3  ;;  %v1076_v12 = vld [vmem:[%s1897_s30 + $0x18] sm:$0xff]  ;;  %v1324_v14 = vpack.c.bf16 %v672_v11, %v671_v10  ;;  %v1077_v15 = vld [vmem:[%s1897_s30 + $0x20] sm:$0xff]  ;;  %v1078_v16 = vld [vmem:[%s1897_s30 + $0x28] sm:$0xff]  ;;  %s952_s8 = sadd.s32 %s1168_s23, %s1161_s24  ;;  %s955_s19 = sshll.u32 %s1977_s26, 4  ;;  %s2015_s19 = int_to_ptr.vmem [resolvable:$true] %s955_s19 }
  0x70   : > { %1323 = vmatpush3.bf16.msra.mxu0 %v1320_v5  ;;  %1230 = vmatprep.subr.mxu1 %v263_v6  ;;  %v1079_v17 = vld [vmem:[%s1897_s30 + $0x30] sm:$0xff]  ;;  %v673_v18 = vld [vmem:[#allocation5 + $0x40] sm:$0xff]  ;;  %v1080_v19 = vld [vmem:[%s1897_s30 + $0x38] sm:$0xff]  ;;  %s1162_s18 = sshll.u32 %s952_s8, 7  ;;  %s2021_s10 = scalar_lea.sflag [#allocation4], %s215_s25 }
  0x71   : > { %1260 = vmatprep.subr.mxu0 %v240_v8  ;;  %1262 = vmatprep.mubr.msk.f32.mxu0 %vm264_vm0, %v222_v9  ;;  %v1081_v20 = vld [vmem:[%s1897_s30 + $0x40] sm:$0xff]  ;;  %v1082_v21 = vld [vmem:[%s1897_s30 + $0x48] sm:$0xff]  ;;  %v1083_v22 = vld [vmem:[%s1897_s30 + $0x50] sm:$0xff]  ;;  %s2013_s12 = scalar_lea.hbm %s2085_s3, %s1162_s18  ;;  %s1542_s15 = scalar_lea.vmem %s2015_s19, 2048 }
  0x72   : > { %v1084_v23 = vld [vmem:[%s1897_s30 + $0x58] sm:$0xff]  ;;  %v1085_v24 = vld [vmem:[%s1897_s30 + $0x60] sm:$0xff]  ;;  %v1086_v25 = vld [vmem:[%s1897_s30 + $0x68] sm:$0xff]  ;;  %p1543_p4 = scmp.ne.s32.totalorder %s2015_s19, %s1542_s15  ;;  %p2118_p7 = scmp.ne.s32.totalorder %s2103_s28, 0 }
  0x73   : > { %1231 = vmatpush3.msra.mxu1 %v263_v6  ;;  %v1087_v26 = vld [vmem:[%s1897_s30 + $0x70] sm:$0xff]  ;;  %v1088_v27 = vld [vmem:[%s1897_s30 + $0x78] sm:$0xff]  ;;  %v1089_v28 = vld [vmem:[%s1897_s30 + $0x80] sm:$0xff]  ;;  %s1674_s6 = smov [#allocation7]  }
  0x74   : > { %1261 = vmatpush3.msra.mxu0 %v240_v8  ;;  %1233 = vmatmul.mubr.msk.f32.vlgmr.msra.gmra.mrb[0].mxu1 %vm264_vm0, %v1076_v12  ;;  %v1090_v29 = vld [vmem:[%s1897_s30 + $0x88] sm:$0xff]  ;;  %v1139_v30 = vld [vmem:[%s1897_s30 + $0x90] sm:$0xff]  ;;  %v1140_v31 = vld [vmem:[%s1897_s30 + $0x98] sm:$0xff]  ;;  %p1544_p9 = pnand %p1543_p4, %p2118_p7  ;;  %s1546_s5 = sshll.u32 %s1674_s6, 4  ;;  %s1547_s5 = int_to_ptr.vmem [resolvable:$false] %s1546_s5 }
  0x75   : > { %1328 = vmatprep.subr.bf16.mxu1 %v1320_v5  ;;  %1263 = vmatmul.mubr.msk.f32.vlgmr.msra.gmra.mrb[0].mxu0 %vm264_vm0, %v223_v13  ;;  %v1971_v41 = vld [vmem:[%s2084_s2] ss:$0 sm:$0xff]  ;;  %s1548_s29 = scalar_lea.vmem %s1547_s5, 4096  ;;  %p1549_p13 = scmp.lt.s32.totalorder %s2015_s19, %s1547_s5 }
  0x76   : > { %1325 = vmatprep.subr.bf16.mxu0 %v1324_v14  ;;  %1330 = vmatpush3.bf16.msra.mxu1 %v1320_v5  ;;  %p1545_p11 = pneg %p1544_p9  ;;  %p1550_p0 = scmp.lt.s32.totalorder %s1548_s29, %s1542_s15 }
  0x77   : > { %1327 = vmatpush3.bf16.msra.mxu0 %v1324_v14  ;;  %1235 = vmatprep.mubr.msk.f32.mxu1 %vm264_vm0, %v1077_v15 }
  0x78   : > { %1265 = vmatprep.mubr.msk.f32.mxu0 %vm264_vm0, %v1075_v7  ;;  %1236 = vmatmul.mubr.msk.f32.gmra.mrb[2].mxu1 %vm264_vm0, %v1078_v16  ;;  %p1551_p2 = por %p1550_p0, %p1549_p13 }
  0x79   : > { %1266 = vmatmul.mubr.msk.f32.gmra.mrb[2].mxu0 %vm264_vm0, %v1076_v12  ;;  %1238 = vmatprep.mubr.msk.f32.mxu1 %vm264_vm0, %v1079_v17 }
  0x7a   : > { %1268 = vmatprep.mubr.msk.f32.mxu0 %vm264_vm0, %v1077_v15  ;;  %1290 = vmatprep.subr.mxu0 %v673_v18  ;;  %p1552_p5 = pnand %p1551_p2, %p1545_p11 }
  0x7b   : > { %1291 = vmatpush3.msra.mxu0 %v673_v18  ;;  %1329 = vmatprep.subr.mxu1 %v240_v8 }
  0x7c   : > { %1239 = vmatmul.mubr.msk.f32.gmra.mrb[4].mxu1 %vm264_vm0, %v1080_v19 }
  0x7d   : > { %1269 = vmatmul.mubr.msk.f32.gmra.mrb[4].mxu0 %vm264_vm0, %v1078_v16  ;;  %1241 = vmatprep.mubr.msk.f32.mxu1 %vm264_vm0, %v1081_v20 }
  0x7e   : > { %1271 = vmatprep.mubr.msk.f32.mxu0 %vm264_vm0, %v1079_v17  ;;  %1331 = vmatpush3.msra.mxu1 %v240_v8 }
  0x80   : > { %1242 = vmatmul.mubr.msk.f32.gmra.mrb[6].mxu1 %vm264_vm0, %v1082_v21 }
  0x81   : > { %1272 = vmatmul.mubr.msk.f32.gmra.mrb[6].mxu0 %vm264_vm0, %v1080_v19  ;;  %1244 = vmatprep.mubr.msk.f32.mxu1 %vm264_vm0, %v1083_v22 }
  0x82   : > { %1292 = vmatprep.mubr.msk.f32.mxu0 %vm264_vm0, %v1077_v15 }
  0x84   : > { %1245 = vmatmul.mubr.msk.f32.gmra.mrb[8].mxu1 %vm264_vm0, %v1084_v23 }
  0x85   : > { %1293 = vmatmul.mubr.msk.f32.vlgmr.msra.gmra.mrb[0].mxu0 %vm264_vm0, %v1078_v16  ;;  %1247 = vmatprep.mubr.msk.f32.mxu1 %vm264_vm0, %v1085_v24 }
  0x86   : > { %1295 = vmatprep.mubr.msk.f32.mxu0 %vm264_vm0, %v1079_v17 }
  0x88   : > { %1248 = vmatmul.mubr.msk.f32.gmra.mrb[10].mxu1 %vm264_vm0, %v1086_v25 }
  0x89   : > { %1296 = vmatmul.mubr.msk.f32.gmra.mrb[2].mxu0 %vm264_vm0, %v1080_v19  ;;  %1250 = vmatprep.mubr.msk.f32.mxu1 %vm264_vm0, %v1087_v26 }
  0x8a   : > { %1298 = vmatprep.mubr.msk.f32.mxu0 %vm264_vm0, %v1081_v20 }
  0x8c   : > { %1251 = vmatmul.mubr.msk.f32.gmra.mrb[12].mxu1 %vm264_vm0, %v1088_v27 }
  0x8d   : > { %1299 = vmatmul.mubr.msk.f32.gmra.mrb[4].mxu0 %vm264_vm0, %v1082_v21  ;;  %1253 = vmatprep.mubr.msk.f32.mxu1 %vm264_vm0, %v1089_v28 }
  0x8e   : > { %1301 = vmatprep.mubr.msk.f32.mxu0 %vm264_vm0, %v1083_v22 }
  0x90   : > { %1254 = vmatmul.mubr.msk.f32.gmra.mrb[14].mxu1 %vm264_vm0, %v1090_v29 }
  0x91   : > { %1302 = vmatmul.mubr.msk.f32.gmra.mrb[6].mxu0 %vm264_vm0, %v1084_v23  ;;  %1274 = vmatprep.mubr.msk.f32.mxu1 %vm264_vm0, %v1081_v20 }
  0x92   : > { %1304 = vmatprep.mubr.msk.f32.mxu0 %vm264_vm0, %v1085_v24 }
  0x94   : > { %1275 = vmatmul.mubr.msk.f32.vlgmr.msra.gmra.mrb[8].mxu1 %vm264_vm0, %v1082_v21 }
  0x95   : > { %1305 = vmatmul.mubr.msk.f32.gmra.mrb[8].mxu0 %vm264_vm0, %v1086_v25  ;;  %1277 = vmatprep.mubr.msk.f32.mxu1 %vm264_vm0, %v1083_v22 }
  0x96   : > { %1307 = vmatprep.mubr.msk.f32.mxu0 %vm264_vm0, %v1087_v26 }
  0x98   : > { %1278 = vmatmul.mubr.msk.f32.gmra.mrb[10].mxu1 %vm264_vm0, %v1084_v23 }
  0x99   : > { %1308 = vmatmul.mubr.msk.f32.gmra.mrb[10].mxu0 %vm264_vm0, %v1088_v27  ;;  %1280 = vmatprep.mubr.msk.f32.mxu1 %vm264_vm0, %v1085_v24 }
  0x9a   : > { %1310 = vmatprep.mubr.msk.f32.mxu0 %vm264_vm0, %v1089_v28 }
  0x9c   : > { %1281 = vmatmul.mubr.msk.f32.gmra.mrb[12].mxu1 %vm264_vm0, %v1086_v25 }
  0x9d   : > { %1311 = vmatmul.mubr.msk.f32.gmra.mrb[12].mxu0 %vm264_vm0, %v1090_v29  ;;  %1283 = vmatprep.mubr.msk.f32.mxu1 %vm264_vm0, %v1087_v26 }
  0x9e   : > { %1313 = vmatprep.mubr.msk.f32.mxu0 %vm264_vm0, %v1139_v30 }
  0xa0   : > { %1284 = vmatmul.mubr.msk.f32.gmra.mrb[14].mxu1 %vm264_vm0, %v1088_v27 }
  0xa1   : > { %1314 = vmatmul.mubr.msk.f32.gmra.mrb[14].mxu0 %vm264_vm0, %v1140_v31 }
 0x147   : > { %v1234_v32 = vpop.f32.mrb[0].mxu1 }
 0x148   : > { %v379_v33 = vpop.f32.mrb[1].mxu1 }
 0x14b   : > { %v1237_v34 = vpop.f32.mrb[2].mxu1 }
 0x14c   : > { %v389_v35 = vpop.f32.mrb[3].mxu1 }
 0x14f   : > { %v1240_v36 = vpop.f32.mrb[4].mxu1 }
 0x150   : > { %v399_v37 = vpop.f32.mrb[5].mxu1 }
 0x153   : > { %v1243_v38 = vpop.f32.mrb[6].mxu1 }
 0x154   : > { %v409_v39 = vpop.f32.mrb[7].mxu1 }
 0x158   : > { %v1294_v40 = vpop.f32.mrb[0].mxu0 }
 0x159   : > { %v1332_v42 = vadd.f32 %v1294_v40, %v1234_v32  ;;  %v788_v43 = vpop.f32.mrb[1].mxu0 }
 0x15a   : > { %v1333_v44 = vadd.f32 %v788_v43, %v379_v33 }
 0x15b   : > { %v891_v45 = vadd.f32 %v1332_v42, %v1971_v41 }
 0x15c   : > { %v890_v46 = vadd.f32 %v1333_v44, %v1971_v41  ;;  %v1297_v47 = vpop.f32.mrb[2].mxu0 }
 0x15d   : > { %v907_v48 = vmax.f32 %v891_v45, 0.0  ;;  %v1334_v49 = vadd.f32 %v1297_v47, %v1237_v34  ;;  %v798_v50 = vpop.f32.mrb[3].mxu0 }
 0x15e   : > { %v906_v51 = vmax.f32 %v890_v46, 0.0  ;;  %v1335_v52 = vadd.f32 %v798_v50, %v389_v35 }
 0x15f   : > { %923 = vst [vmem:[%s1977_s26 + $0x8] sm:$0xff] %v907_v48  ;;  %v893_v53 = vadd.f32 %v1334_v49, %v1971_v41 }
 0x160   : > { %922 = vst [vmem:[%s1977_s26] sm:$0xff] %v906_v51  ;;  %v892_v54 = vadd.f32 %v1335_v52, %v1971_v41  ;;  %v1300_v55 = vpop.f32.mrb[4].mxu0 }
 0x161   : > { %v909_v56 = vmax.f32 %v893_v53, 0.0  ;;  %v1336_v57 = vadd.f32 %v1300_v55, %v1240_v36  ;;  %v808_v58 = vpop.f32.mrb[5].mxu0 }
 0x162   : > { %v908_v59 = vmax.f32 %v892_v54, 0.0  ;;  %v1337_v60 = vadd.f32 %v808_v58, %v399_v37 }
 0x163   : > { %925 = vst [vmem:[%s1977_s26 + $0x18] sm:$0xff] %v909_v56  ;;  %v895_v61 = vadd.f32 %v1336_v57, %v1971_v41 }
 0x164   : > { %924 = vst [vmem:[%s1977_s26 + $0x10] sm:$0xff] %v908_v59  ;;  %v894_v62 = vadd.f32 %v1337_v60, %v1971_v41  ;;  %v1303_v63 = vpop.f32.mrb[6].mxu0 }
 0x165   : > { %v911_v0 = vmax.f32 %v895_v61, 0.0  ;;  %v1338_v1 = vadd.f32 %v1303_v63, %v1243_v38  ;;  %v818_v2 = vpop.f32.mrb[7].mxu0 }
 0x166   : > { %v910_v3 = vmax.f32 %v894_v62, 0.0  ;;  %v1339_v4 = vadd.f32 %v818_v2, %v409_v39 }
 0x167   : > { %927 = vst [vmem:[%s1977_s26 + $0x28] sm:$0xff] %v911_v0  ;;  %v897_v5 = vadd.f32 %v1338_v1, %v1971_v41  ;;  %v1276_v6 = vpop.f32.mrb[8].mxu1 }
 0x168   : > { %926 = vst [vmem:[%s1977_s26 + $0x20] sm:$0xff] %v910_v3  ;;  %v896_v7 = vadd.f32 %v1339_v4, %v1971_v41  ;;  %v1306_v8 = vpop.f32.mrb[8].mxu0  ;;  %v612_v9 = vpop.f32.mrb[9].mxu1 }
 0x169   : > { %v913_v10 = vmax.f32 %v897_v5, 0.0  ;;  %v1340_v11 = vadd.f32 %v1306_v8, %v1276_v6  ;;  %v828_v12 = vpop.f32.mrb[9].mxu0 }
 0x16a   : > { %v912_v13 = vmax.f32 %v896_v7, 0.0  ;;  %v1341_v14 = vadd.f32 %v828_v12, %v612_v9 }
 0x16b   : > { %929 = vst [vmem:[%s1977_s26 + $0x38] sm:$0xff] %v913_v10  ;;  %v899_v15 = vadd.f32 %v1340_v11, %v1971_v41  ;;  %v1279_v16 = vpop.f32.mrb[10].mxu1 }
 0x16c   : > { %928 = vst [vmem:[%s1977_s26 + $0x30] sm:$0xff] %v912_v13  ;;  %v898_v17 = vadd.f32 %v1341_v14, %v1971_v41  ;;  %v1309_v18 = vpop.f32.mrb[10].mxu0  ;;  %v622_v19 = vpop.f32.mrb[11].mxu1 }
 0x16d   : > { %v915_v20 = vmax.f32 %v899_v15, 0.0  ;;  %v1342_v21 = vadd.f32 %v1309_v18, %v1279_v16  ;;  %v838_v22 = vpop.f32.mrb[11].mxu0 }
 0x16e   : > { %v914_v23 = vmax.f32 %v898_v17, 0.0  ;;  %v1343_v24 = vadd.f32 %v838_v22, %v622_v19 }
 0x16f   : > { %931 = vst [vmem:[%s1977_s26 + $0x48] sm:$0xff] %v915_v20  ;;  %v901_v25 = vadd.f32 %v1342_v21, %v1971_v41  ;;  %v1282_v26 = vpop.f32.mrb[12].mxu1 }
 0x170   : > { %930 = vst [vmem:[%s1977_s26 + $0x40] sm:$0xff] %v914_v23  ;;  %v900_v27 = vadd.f32 %v1343_v24, %v1971_v41  ;;  %v1312_v28 = vpop.f32.mrb[12].mxu0  ;;  %v632_v29 = vpop.f32.mrb[13].mxu1 }
 0x171   : > { %v917_v30 = vmax.f32 %v901_v25, 0.0  ;;  %v1344_v31 = vadd.f32 %v1312_v28, %v1282_v26  ;;  %v848_v32 = vpop.f32.mrb[13].mxu0 }
 0x172   : > { %v916_v33 = vmax.f32 %v900_v27, 0.0  ;;  %v1345_v34 = vadd.f32 %v848_v32, %v632_v29 }
 0x173   : > { %933 = vst [vmem:[%s1977_s26 + $0x58] sm:$0xff] %v917_v30  ;;  %v903_v35 = vadd.f32 %v1344_v31, %v1971_v41  ;;  %v1285_v36 = vpop.f32.mrb[14].mxu1 }
 0x174   : > { %932 = vst [vmem:[%s1977_s26 + $0x50] sm:$0xff] %v916_v33  ;;  %v902_v37 = vadd.f32 %v1345_v34, %v1971_v41  ;;  %v1315_v38 = vpop.f32.mrb[14].mxu0  ;;  %v642_v39 = vpop.f32.mrb[15].mxu1 }
 0x175   : > { %v919_v40 = vmax.f32 %v903_v35, 0.0  ;;  %v1346_v42 = vadd.f32 %v1315_v38, %v1285_v36  ;;  %v858_v43 = vpop.f32.mrb[15].mxu0 }
 0x176   : > { %v918_v44 = vmax.f32 %v902_v37, 0.0  ;;  %v1347_v45 = vadd.f32 %v858_v43, %v642_v39 }
 0x177   : > { %935 = vst [vmem:[%s1977_s26 + $0x68] sm:$0xff] %v919_v40  ;;  %v905_v46 = vadd.f32 %v1346_v42, %v1971_v41 }
 0x178   : > { %934 = vst [vmem:[%s1977_s26 + $0x60] sm:$0xff] %v918_v44  ;;  %v904_v47 = vadd.f32 %v1347_v45, %v1971_v41 }
 0x179   : > { %v921_v48 = vmax.f32 %v905_v46, 0.0 }
 0x17a   : > { %v920_v49 = vmax.f32 %v904_v47, 0.0 }
 0x17b   : > { %937 = vst [vmem:[%s1977_s26 + $0x78] sm:$0xff] %v921_v48 }
 0x17c   : > { %936 = vst [vmem:[%s1977_s26 + $0x70] sm:$0xff] %v920_v49 }
 0x17d   : > { %1555 = shalt.err (!%p1552_p5)
}
 0x17e   : > { %s1556_s30 = scalar_lea.hbm %s2013_s12, 2048  ;;  %s1560_s11 = scalar_lea.hbm %s2085_s3, 8192 }
 0x17f   : > { %p1557_p8 = scmp.ne.s32.totalorder %s2013_s12, %s1556_s30  ;;  %p1561_p6 = scmp.lt.u32.totalorder %s2013_s12, %s2085_s3 }
 0x180   : > { %p1562_p10 = scmp.lt.u32.totalorder %s1560_s11, %s1556_s30  ;;  %p1564_p4 = scmp.lt.u32.totalorder %s1556_s30, %s2013_s12 }
 0x181   : > { %p1558_p12 = pnand %p1557_p8, %p2118_p7 }
 0x182   : > { %p1563_p3 = por %p1562_p10, %p1561_p6 }
 0x183   : > { %p1559_p1 = pneg %p1558_p12 }
 0x184   : > { %p1565_p9 = por %p1564_p4, %p1563_p3 }
 0x186   : > { %p1566_p11 = pnand %p1565_p9, %p1559_p1 }
 0x188   : > { %1569 = shalt.err (!%p1566_p11)
}
 0x189   : > { %s1675_s23 = smov 128   ;;  %s1676_s24 = smov 8  }
 0x18a   : > { %1373 = dma.vmem_to_hbm [thread:$0]  (%p2118_p7), %s2015_s19, 2048, %s2013_s12, %s2021_s10, %s1675_s23, %s1675_s23, %s1676_s24  }
 0x18b PF: > { %s2119_s8 = sld [smem:[#allocation11_spill]]  ;;  %s2120_s18 = sld [smem:[#allocation13_spill]] }
 0x18c   : > { %p1390_p13 = scmp.ge.s32.totalorder %s1668_s22, 2 }
 0x191   : > { %s970_s9 = sand.u32 1, %s2119_s8   ;;  %p2121_p0 = scmp.ne.s32.totalorder %s2120_s18, 0 }
 0x192   : > { %s971_s20 = scalar_lea.sflag [#allocation4], %s970_s9 }
 0x193   : > { %p1384_p2 = pnand %p1390_p13, %p2121_p0 }
 0x195   : > { %1623 = dma.done.wait (!%p1384_p2), %s971_s20, 2048  }
 0x196   : > { %1625 = vsyncadd (!%p1384_p2), %s971_s20, 4294965248  ;;  %s20_s22 = sadd.s32 1, %s1668_s22   ;;  %s2122_s18 = sld [smem:[#allocation12_spill]] }
 0x197   : > { %p17_p5 = scmp.ge.s32.totalorder %s20_s22, 6   ;;  %s2123_s20 = sld [smem:[#allocation14_spill]] }
 0x198   : > { %s2124_s28 = sld [smem:[#allocation15_spill]]  ;;  %s2125_s12 = smov %s1632_s13 }
 0x199   : > { %s2126_s13 = smov %s1636_s14  ;;  %s2127_s14 = smov %s1837_s1 }
 0x19a   : > { %s2128_s15 = smov %s1644_s16  ;;  %s2129_s16 = smov %s1648_s17 }
 0x19b   : > { %s2130_s17 = smov %s1832_s7  ;;  %s2131_s19 = smov %s1664_s21 }
 0x19c   :  { %19 = sbr.rel (!%p17_p5) target bundleno = 12 (0xc), region = 86 }
 0x19e   : > { %s2132_s21 = smov %s2124_s28 }
 0x1a3   :  { %976 = vsyncpa [#allocation3], 1 }
 0x1a4   :  { %978 = vsyncpa [#allocation3 + $0x1], 1 }
 0x1a5   :  { %979 = vsyncpa [#allocation6], 1 }
 0x1a6   :  { %980 = vsyncpa [#allocation4], 1 }
 0x1a7   :  { %982 = vsyncpa [#allocation4 + $0x1], 1 }

</bundles_post_ra>
